<compile_context>
chip_gen: v5e
topology: v5e:2x2
jax: 0.10.0
libtpu: 0.0.40
codegen_flags: <defaults>
</compile_context>

<pallas_src>
import functools

import jax
import jax.numpy as jnp
import numpy as np
from jax.experimental import pallas as pl
from jax.experimental.pallas import tpu as pltpu

LN_EPS = 1e-5  # torch.nn.LayerNorm default eps


def _sgu_kernel(z_ref, cnt_ref, winv_ref, gamma_ref, beta_ref, alpha_ref, out_ref):
    # z_ref     : VMEM (rmax, D, B)    -- packed rows, lane-dense on the set axis
    # cnt_ref   : VMEM (1, 1, B) int32 -- rows in each set of this tile
    # winv_ref  : VMEM (1, 1, B) f32   -- 1 / max(count, 1)
    # gamma_ref : VMEM (1, Dh, 1)      -- LayerNorm weight
    # beta_ref  : VMEM (1, Dh, 1)      -- LayerNorm bias
    # alpha_ref : SMEM (1,) f32        -- module's self.alpha
    # out_ref   : VMEM (rmax, Dh, B)
    rmax = out_ref.shape[0]
    dh = out_ref.shape[1]
    nb = out_ref.shape[2]

    z = z_ref[...]
    z1 = z[:, :dh, :].astype(jnp.float32)   # clean sublane slice (Dh multiple of 8)
    z2 = z[:, dh:, :].astype(jnp.float32)

    # LayerNorm over the feature (sublane) dim, biased variance like torch.
    mu = jnp.mean(z2, axis=1, keepdims=True)
    cen = z2 - mu
    var = jnp.mean(cen * cen, axis=1, keepdims=True)
    ln = cen * jax.lax.rsqrt(var + LN_EPS)
    ln = ln * gamma_ref[...] + beta_ref[...]                    # (1,Dh,1) broadcast

    # means_over_rows(..., keepdim=True): masked mean over each set's valid
    # rows, vectorized across the B sets (lanes) of this tile.
    row_ids = jax.lax.broadcasted_iota(jnp.int32, (rmax, 1, nb), 0)
    mask = row_ids < cnt_ref[...]                               # (rmax, 1, B)
    seg_sum = jnp.sum(jnp.where(mask, ln, 0.0), axis=0, keepdims=True)
    seg_mean = seg_sum * winv_ref[...]                          # (1, Dh, B)

    gate = 1.0 + alpha_ref[0] * ln + seg_mean
    out_ref[...] = (z1 * gate).astype(out_ref.dtype)


@functools.partial(jax.jit, static_argnames=("rmax", "block_sets", "vmem_limit"))
def _sgu_forward(z_rd, counts, gamma, beta_ln, alpha, *, rmax, block_sets, vmem_limit):
    R, D = z_rd.shape
    Dh = D // 2
    S = counts.shape[0]
    B = block_sets
    S_pad = ((S + B - 1) // B) * B
    grid = (S_pad // B,)

    counts_i = counts.astype(jnp.int32)
    offsets = jnp.concatenate(
        [jnp.zeros((1,), jnp.int32), jnp.cumsum(counts_i)[:-1]]
    )
    counts_pad = jnp.pad(counts_i, (0, S_pad - S))
    offsets_pad = jnp.pad(offsets, (0, S_pad - S))

    # Pack ragged rows with one clipped gather, then put the set axis on the
    # lanes: (rmax, D, S_pad).  Rows past a set's count hold harmless
    # neighbouring data (masked in the kernel, never un-gathered).
    gather_idx = jnp.clip(
        offsets_pad[:, None] + jnp.arange(rmax, dtype=jnp.int32)[None, :], 0, R - 1
    )                                                            # (S_pad, rmax)
    z_lane = jnp.transpose(jnp.take(z_rd, gather_idx, axis=0), (1, 2, 0))

    cnt_lane = counts_pad.reshape(1, 1, S_pad)
    winv_lane = (1.0 / jnp.maximum(counts_pad.astype(jnp.float32), 1.0)).reshape(
        1, 1, S_pad
    )

    itemsize = jnp.dtype(z_rd.dtype).itemsize
    cost = pl.CostEstimate(
        flops=int(16 * S_pad * rmax * Dh),
        transcendentals=int(S_pad * rmax),
        bytes_accessed=int(itemsize * S_pad * rmax * (D + Dh) + 8 * S_pad),
    )

    out_lane = pl.pallas_call(
        _sgu_kernel,
        out_shape=jax.ShapeDtypeStruct((rmax, Dh, S_pad), z_rd.dtype),
        grid=grid,
        in_specs=[
            pl.BlockSpec((rmax, D, B), lambda s: (0, 0, s)),      # packed z
            pl.BlockSpec((1, 1, B), lambda s: (0, 0, s)),         # counts (lanes)
            pl.BlockSpec((1, 1, B), lambda s: (0, 0, s)),         # 1/count (lanes)
            pl.BlockSpec((1, Dh, 1), lambda s: (0, 0, 0)),        # LN weight
            pl.BlockSpec((1, Dh, 1), lambda s: (0, 0, 0)),        # LN bias
            pl.BlockSpec(memory_space=pltpu.MemorySpace.SMEM),    # alpha
        ],
        out_specs=pl.BlockSpec((rmax, Dh, B), lambda s: (0, 0, s)),
        compiler_params=pltpu.CompilerParams(
            dimension_semantics=("parallel",),      # shard set-batches on v7x
            vmem_limit_bytes=int(vmem_limit),
        ),
        cost_estimate=cost,
    )(
        z_lane,
        cnt_lane,
        winv_lane,
        gamma.reshape(1, Dh, 1).astype(jnp.float32),
        beta_ln.reshape(1, Dh, 1).astype(jnp.float32),
        jnp.asarray(alpha, jnp.float32).reshape(1),
    )

    # Unpack back to the ragged (R, Dh) layout with a single gather (jittable).
    out_pad = jnp.transpose(out_lane, (2, 0, 1))                 # (S_pad, rmax, Dh)
    set_ids = jnp.repeat(
        jnp.arange(S, dtype=jnp.int32), counts_i, total_repeat_length=R
    )
    pos_in_set = jnp.arange(R, dtype=jnp.int32) - offsets[set_ids]
    unpad_idx = set_ids * rmax + pos_in_set
    return jnp.take(out_pad.reshape(S_pad * rmax, Dh), unpad_idx, axis=0, mode="clip")


def _round_up(x, m):
    return ((x + m - 1) // m) * m


def _vmem_budget():
    """(double-buffered working-set budget, vmem_limit_bytes) per generation."""
    cap = 64 * 1024 * 1024
    try:
        info = pltpu.get_tpu_info()
        cap = int(getattr(info, "vmem_capacity_bytes", cap))
    except Exception:
        pass
    if cap >= 96 * 1024 * 1024:
        # v5e / v6e: 128 MiB physical VMEM -> big tiles, generous scoped limit.
        return 32 * 1024 * 1024, 80 * 1024 * 1024
    # v7x: 64 MiB per TensorCore -> keep the pipeline well under the limit.
    return 20 * 1024 * 1024, 48 * 1024 * 1024


def spatial_gating_unit(z_rd, counts, gamma, beta_ln, alpha, max_rows_per_set=None):
    """JAX/Pallas forward of permutect's SpacialGatingUnit.

    z_rd: (R, d_z), counts: (S,) int with sum(counts) == R.  Returns (R, d_z // 2).
    Pass `max_rows_per_set` (static upper bound on max(counts)) to avoid the
    device->host sync and keep the whole call jittable from the caller's side.
    """
    R, D = z_rd.shape
    Dh = D // 2
    S = int(counts.shape[0])

    if max_rows_per_set is None:
        max_rows_per_set = int(jax.device_get(jnp.max(counts)))  # one-time sync
    # Bucket rmax to a power of two (>= 8) so compiled variants stay bounded.
    rmax = 8
    while rmax < int(max_rows_per_set):
        rmax *= 2

    ws_budget, vmem_limit = _vmem_budget()

    # Padded per-set (per-lane) VMEM bytes: (8,128) tile padding on the minor
    # two dims, x2 for the double-buffered pipeline.  The lane dim is the set
    # axis (multiple of 128) so only the sublane dim pads.
    itemsize = int(jnp.dtype(z_rd.dtype).itemsize)
    sub = {4: 8, 2: 16, 1: 32}.get(itemsize, 8)
    bytes_per_set = 2 * (
        rmax * _round_up(D, sub) * itemsize       # z block
        + rmax * _round_up(Dh, sub) * itemsize    # out block
        + 8 * 4 + 8 * 4                           # count + 1/count lane vectors
    )
    side_bytes = 64 * 1024                        # gamma/beta tiles + slack
    block_sets = max(128, ((ws_budget - side_bytes) // bytes_per_set) // 128 * 128)
    # Guarantee >= ~4 grid steps when S is large enough (v7x megacore sharding
    # across its two TensorCores + DMA/compute overlap everywhere).
    grid_cap = max(128, _round_up((S + 3) // 4, 128))
    block_sets = int(min(block_sets, grid_cap))

    return _sgu_forward(
        z_rd, counts, gamma, beta_ln, alpha,
        rmax=rmax, block_sets=block_sets, vmem_limit=vmem_limit,
    )


def _reference(z_rd, counts, gamma, beta_ln, alpha):
    """Pure NumPy reference reproducing the PyTorch forward."""
    z = np.asarray(z_rd, dtype=np.float64)
    counts_np = np.asarray(counts)
    Dh = z.shape[1] // 2
    z1, z2 = z[:, :Dh], z[:, Dh:]
    mu = z2.mean(-1, keepdims=True)
    var = ((z2 - mu) ** 2).mean(-1, keepdims=True)
    ln = (z2 - mu) / np.sqrt(var + LN_EPS) * np.asarray(gamma) + np.asarray(beta_ln)
    means = np.zeros_like(ln)
    off = 0
    for c in counts_np:
        if c > 0:
            means[off:off + c] = ln[off:off + c].mean(0, keepdims=True)
        off += c
    return z1 * (1.0 + float(alpha) * ln + means)


if __name__ == "__main__":
    key = jax.random.PRNGKey(0)
    kz, kg, kb = jax.random.split(key, 3)

    d_z = 32                                                   # d_ffn of the SGU block
    counts = jnp.array([5, 3, 4, 7, 1, 6], dtype=jnp.int32)    # ragged set sizes
    R = int(np.sum(np.asarray(counts)))
    z_rd = jax.random.normal(kz, (R, d_z), dtype=jnp.float32)

    # LayerNorm params (perturbed from the ones/zeros init to exercise the path)
    gamma = 1.0 + 0.1 * jax.random.normal(kg, (d_z // 2,), dtype=jnp.float32)
    beta_ln = 0.1 * jax.random.normal(kb, (d_z // 2,), dtype=jnp.float32)
    alpha = jnp.array(0.01, jnp.float32)                       # self.alpha
    # NOTE: the module also declares self.beta = 0.01 but never uses it in forward.

    out = spatial_gating_unit(z_rd, counts, gamma, beta_ln, alpha)
    out = jax.block_until_ready(out)

    ref = _reference(z_rd, counts, gamma, beta_ln, alpha)
    np.testing.assert_allclose(np.asarray(out), ref, rtol=1e-4, atol=1e-5)
    print("KERNEL_OK")
</pallas_src>

<mosaic_0001>
module attributes {stable_mosaic.version = 11 : i64} {
  func.func @_sgu_kernel(%arg0: i32, %arg1: memref<8x32x128xf32, #tpu.memory_space<vmem>>, %arg2: memref<1x1x128xi32, #tpu.memory_space<vmem>>, %arg3: memref<1x1x128xf32, #tpu.memory_space<vmem>>, %arg4: memref<1x16x1xf32, #tpu.memory_space<vmem>>, %arg5: memref<1x16x1xf32, #tpu.memory_space<vmem>>, %arg6: memref<1xf32, #tpu.memory_space<smem>>, %arg7: memref<8x16x128xf32, #tpu.memory_space<vmem>>) attributes {dimension_semantics = [#tpu.dimension_semantics<parallel>], iteration_bounds = array<i64: 1>, scalar_prefetch = 0 : i64, scratch_operands = 0 : i64, tpu.core_type = #tpu.core_type<tc>, window_params = [{transform_indices = @transform_0, window_bounds = array<i64: 8, 32, 128>}, {transform_indices = @transform_1, window_bounds = array<i64: 1, 1, 128>}, {transform_indices = @transform_2, window_bounds = array<i64: 1, 1, 128>}, {pipeline_mode = #tpu.pipeline_mode<synchronous>, transform_indices = @transform_3, window_bounds = array<i64: 1, 16, 1>}, {pipeline_mode = #tpu.pipeline_mode<synchronous>, transform_indices = @transform_4, window_bounds = array<i64: 1, 16, 1>}, {transform_indices = @transform_5, window_bounds = array<i64: 1>}, {transform_indices = @transform_6, window_bounds = array<i64: 8, 16, 128>}]} {
    %c0 = arith.constant 0 : index
    %c0_0 = arith.constant 0 : index
    %c0_1 = arith.constant 0 : index
    %0 = vector.load %arg1[%c0, %c0_0, %c0_1] : memref<8x32x128xf32, #tpu.memory_space<vmem>>, vector<8x32x128xf32>
    %1 = vector.extract_strided_slice %0 {offsets = [0, 0, 0], sizes = [8, 16, 128], strides = [1, 1, 1]} : vector<8x32x128xf32> to vector<8x16x128xf32>
    %2 = vector.extract_strided_slice %0 {offsets = [0, 16, 0], sizes = [8, 16, 128], strides = [1, 1, 1]} : vector<8x32x128xf32> to vector<8x16x128xf32>
    %cst = arith.constant dense<0.000000e+00> : vector<8x128xf32>
    %3 = vector.multi_reduction <add>, %2, %cst [1] : vector<8x16x128xf32> to vector<8x128xf32>
    %4 = vector.shape_cast %3 : vector<8x128xf32> to vector<8x1x128xf32>
    %cst_2 = arith.constant 1.600000e+01 : f32
    %5 = vector.broadcast %cst_2 : f32 to vector<8x1x128xf32>
    %6 = arith.divf %4, %5 : vector<8x1x128xf32>
    %7 = vector.broadcast %6 : vector<8x1x128xf32> to vector<8x16x128xf32>
    %8 = arith.subf %2, %7 : vector<8x16x128xf32>
    %9 = arith.mulf %8, %8 : vector<8x16x128xf32>
    %cst_3 = arith.constant dense<0.000000e+00> : vector<8x128xf32>
    %10 = vector.multi_reduction <add>, %9, %cst_3 [1] : vector<8x16x128xf32> to vector<8x128xf32>
    %11 = vector.shape_cast %10 : vector<8x128xf32> to vector<8x1x128xf32>
    %cst_4 = arith.constant 1.600000e+01 : f32
    %12 = vector.broadcast %cst_4 : f32 to vector<8x1x128xf32>
    %13 = arith.divf %11, %12 : vector<8x1x128xf32>
    %cst_5 = arith.constant 9.99999974E-6 : f32
    %14 = vector.broadcast %cst_5 : f32 to vector<8x1x128xf32>
    %15 = arith.addf %13, %14 : vector<8x1x128xf32>
    %16 = math.rsqrt %15 : vector<8x1x128xf32>
    %17 = vector.broadcast %16 : vector<8x1x128xf32> to vector<8x16x128xf32>
    %18 = arith.mulf %8, %17 : vector<8x16x128xf32>
    %c0_6 = arith.constant 0 : index
    %c0_7 = arith.constant 0 : index
    %c0_8 = arith.constant 0 : index
    %19 = vector.load %arg4[%c0_6, %c0_7, %c0_8] : memref<1x16x1xf32, #tpu.memory_space<vmem>>, vector<1x16x1xf32>
    %20 = vector.broadcast %19 : vector<1x16x1xf32> to vector<8x16x128xf32>
    %21 = arith.mulf %18, %20 : vector<8x16x128xf32>
    %c0_9 = arith.constant 0 : index
    %c0_10 = arith.constant 0 : index
    %c0_11 = arith.constant 0 : index
    %22 = vector.load %arg5[%c0_9, %c0_10, %c0_11] : memref<1x16x1xf32, #tpu.memory_space<vmem>>, vector<1x16x1xf32>
    %23 = vector.broadcast %22 : vector<1x16x1xf32> to vector<8x16x128xf32>
    %24 = arith.addf %21, %23 : vector<8x16x128xf32>
    %25 = tpu.iota {dimensions = array<i32: 0>} : vector<8x1x128xi32>
    %c0_12 = arith.constant 0 : index
    %c0_13 = arith.constant 0 : index
    %c0_14 = arith.constant 0 : index
    %26 = vector.load %arg2[%c0_12, %c0_13, %c0_14] : memref<1x1x128xi32, #tpu.memory_space<vmem>>, vector<1x1x128xi32>
    %27 = vector.broadcast %26 : vector<1x1x128xi32> to vector<8x1x128xi32>
    %28 = arith.cmpi slt, %25, %27 : vector<8x1x128xi32>
    %cst_15 = arith.constant 0.000000e+00 : f32
    %29 = vector.shape_cast %28 : vector<8x1x128xi1> to vector<8x1x128xi1>
    %30 = vector.broadcast %29 : vector<8x1x128xi1> to vector<8x16x128xi1>
    %31 = vector.broadcast %cst_15 : f32 to vector<8x16x128xf32>
    %32 = arith.select %30, %24, %31 : vector<8x16x128xi1>, vector<8x16x128xf32>
    %cst_16 = arith.constant dense<0.000000e+00> : vector<16x128xf32>
    %33 = vector.multi_reduction <add>, %32, %cst_16 [0] : vector<8x16x128xf32> to vector<16x128xf32>
    %34 = vector.shape_cast %33 : vector<16x128xf32> to vector<1x16x128xf32>
    %c0_17 = arith.constant 0 : index
    %c0_18 = arith.constant 0 : index
    %c0_19 = arith.constant 0 : index
    %35 = vector.load %arg3[%c0_17, %c0_18, %c0_19] : memref<1x1x128xf32, #tpu.memory_space<vmem>>, vector<1x1x128xf32>
    %36 = vector.broadcast %35 : vector<1x1x128xf32> to vector<1x16x128xf32>
    %37 = arith.mulf %34, %36 : vector<1x16x128xf32>
    %c0_20 = arith.constant 0 : index
    %38 = memref.load %arg6[%c0_20] : memref<1xf32, #tpu.memory_space<smem>>
    %39 = vector.broadcast %38 : f32 to vector<8x16x128xf32>
    %40 = arith.mulf %39, %24 : vector<8x16x128xf32>
    %cst_21 = arith.constant 1.000000e+00 : f32
    %41 = vector.broadcast %cst_21 : f32 to vector<8x16x128xf32>
    %42 = arith.addf %41, %40 : vector<8x16x128xf32>
    %43 = vector.broadcast %37 : vector<1x16x128xf32> to vector<8x16x128xf32>
    %44 = arith.addf %42, %43 : vector<8x16x128xf32>
    %45 = arith.mulf %1, %44 : vector<8x16x128xf32>
    %c0_22 = arith.constant 0 : index
    %c0_23 = arith.constant 0 : index
    %c0_24 = arith.constant 0 : index
    %46 = vector.load %arg7[%c0_22, %c0_23, %c0_24] : memref<8x16x128xf32, #tpu.memory_space<vmem>>, vector<8x16x128xf32>
    tpu.vector_store %arg7[%c0_22, %c0_23, %c0_24], %45 {strides = array<i32>} : memref<8x16x128xf32, #tpu.memory_space<vmem>>, vector<8x16x128xf32>,
    return
  }
  func.func @transform_0(%arg0: i32) -> (i32, i32, i32) {
    %c0_i32 = arith.constant 0 : i32
    %c0_i32_0 = arith.constant 0 : i32
    %c0_i32_1 = arith.constant 0 : i32
    return %c0_i32, %c0_i32_0, %arg0 : i32, i32, i32
  }
  func.func @transform_1(%arg0: i32) -> (i32, i32, i32) {
    %c0_i32 = arith.constant 0 : i32
    %c0_i32_0 = arith.constant 0 : i32
    %c0_i32_1 = arith.constant 0 : i32
    return %c0_i32, %c0_i32_0, %arg0 : i32, i32, i32
  }
  func.func @transform_2(%arg0: i32) -> (i32, i32, i32) {
    %c0_i32 = arith.constant 0 : i32
    %c0_i32_0 = arith.constant 0 : i32
    %c0_i32_1 = arith.constant 0 : i32
    return %c0_i32, %c0_i32_0, %arg0 : i32, i32, i32
  }
  func.func @transform_3(%arg0: i32) -> (i32, i32, i32) {
    %c0_i32 = arith.constant 0 : i32
    %c0_i32_0 = arith.constant 0 : i32
    %c0_i32_1 = arith.constant 0 : i32
    %c0_i32_2 = arith.constant 0 : i32
    return %c0_i32, %c0_i32_0, %c0_i32_1 : i32, i32, i32
  }
  func.func @transform_4(%arg0: i32) -> (i32, i32, i32) {
    %c0_i32 = arith.constant 0 : i32
    %c0_i32_0 = arith.constant 0 : i32
    %c0_i32_1 = arith.constant 0 : i32
    %c0_i32_2 = arith.constant 0 : i32
    return %c0_i32, %c0_i32_0, %c0_i32_1 : i32, i32, i32
  }
  func.func @transform_5(%arg0: i32) -> i32 {
    %c0_i32 = arith.constant 0 : i32
    %c0_i32_0 = arith.constant 0 : i32
    return %c0_i32 : i32
  }
  func.func @transform_6(%arg0: i32) -> (i32, i32, i32) {
    %c0_i32 = arith.constant 0 : i32
    %c0_i32_0 = arith.constant 0 : i32
    %c0_i32_1 = arith.constant 0 : i32
    return %c0_i32, %c0_i32_0, %arg0 : i32, i32, i32
  }
}

</mosaic_0001>

<bundles_post_ra>
// kernel: _sgu_forward.1
= control target key start
LH: loop header
LB: loop body
LE: loop exit
PB: predicated region body
PF: predicated region fallthrough
CT: control target
= control target key end

     0   :  { %v561_v0 = vmov 0   ;;  %v562_v5 = vmov 16.0   ;;  %s1189_s4 = inlined_call_operand.vmem [shape: f32[1,16,1], index: 4, kind: input, shape index: {}]   ;;  %s1190_s3 = inlined_call_operand.vmem [shape: f32[1,16,1], index: 3, kind: input, shape index: {}]   ;;  %s1191_s2 = inlined_call_operand.vmem [shape: f32[1,1,128], index: 2, kind: input, shape index: {}]   ;;  %s1192_s0 = inlined_call_operand.vmem [shape: f32[8,32,128], index: 0, kind: input, shape index: {}]   ;;  %s1193_s1 = inlined_call_operand.vmem [shape: s32[1,1,128], index: 1, kind: input, shape index: {}]   ;;  %s1194_s5 = inlined_call_operand.<no memory space> [shape: f32[1], index: 5, kind: input, shape index: {}]   ;;  %s1195_s6 = inlined_call_operand.vmem [shape: f32[8,16,128], index: 6, kind: output, shape index: {}]  }
   0x1   :  { %541 = vset.pattern.permute.xlu1 %v561_v0  ;;  %540 = vset.pattern.permute.xlu0 %v561_v0  ;;  %v355_v1 = vld [vmem:[%s1189_s4] sm:$0xff]  ;;  %v356_v3 = vld [vmem:[%s1189_s4 + $0x8] sm:$0xff]  ;;  %543 = vrcp.f32 %v562_v5  ;;  %v615_v6 = vld [vmem:[%s1192_s0 + $0x10] sm:$0xff] }
   0x2   :  { %v327_v2 = vld [vmem:[%s1190_s3] sm:$0xff]  ;;  %359 = vperm.xlu1 %541, %v355_v1   ;;  %v328_v4 = vld [vmem:[%s1190_s3 + $0x8] sm:$0xff]  ;;  %v620_v7 = vld [vmem:[%s1192_s0 + $0x18] sm:$0xff] }
   0x3   :  { %331 = vperm.xlu0 %540, %v327_v2   ;;  %v625_v8 = vld [vmem:[%s1192_s0 + $0x30] sm:$0xff]  ;;  %v630_v9 = vld [vmem:[%s1192_s0 + $0x38] sm:$0xff]  ;;  %v56_v12 = vadd.f32 %v620_v7, %v615_v6 }
   0x4   :  { %v635_v10 = vld [vmem:[%s1192_s0 + $0x50] sm:$0xff]  ;;  %v640_v11 = vld [vmem:[%s1192_s0 + $0x58] sm:$0xff]  ;;  %v63_v16 = vadd.f32 %v630_v9, %v625_v8 }
   0x5   :  { %v647_v13 = vld [vmem:[%s1192_s0 + $0x70] sm:$0xff]  ;;  %v652_v14 = vld [vmem:[%s1192_s0 + $0x78] sm:$0xff]  ;;  %v70_v17 = vadd.f32 %v640_v11, %v635_v10  ;;  %v57_v21 = vrot.slane %v56_v12, 4 }
   0x6   :  { %v657_v15 = vld [vmem:[%s1192_s0 + $0x90] sm:$0xff]  ;;  %v666_v18 = vld [vmem:[%s1192_s0 + $0x98] sm:$0xff]  ;;  %v77_v22 = vadd.f32 %v652_v14, %v647_v13  ;;  %v64_v25 = vrot.slane %v63_v16, 4 }
   0x7   :  { %v671_v19 = vld [vmem:[%s1192_s0 + $0xb0] sm:$0xff]  ;;  %v676_v20 = vld [vmem:[%s1192_s0 + $0xb8] sm:$0xff]  ;;  %v71_v26 = vrot.slane %v70_v17, 4  ;;  %v84_v27 = vadd.f32 %v666_v18, %v657_v15  ;;  %v544_v29 = vpop.eup %543  ;;  %v58_v30 = vadd.f32 %v57_v21, %v56_v12 }
   0x8   :  { %v683_v23 = vld [vmem:[%s1192_s0 + $0xd0] sm:$0xff]  ;;  %v688_v24 = vld [vmem:[%s1192_s0 + $0xd8] sm:$0xff]  ;;  %v91_v28 = vadd.f32 %v676_v20, %v671_v19  ;;  %v78_v31 = vrot.slane %v77_v22, 4  ;;  %v113_v33 = vmul.f32 16.0, %v544_v29  ;;  %v65_v34 = vadd.f32 %v64_v25, %v63_v16 }
   0x9   :  { %v98_v32 = vadd.f32 %v688_v24, %v683_v23  ;;  %v72_v35 = vadd.f32 %v71_v26, %v70_v17  ;;  %v85_v36 = vrot.slane %v84_v27, 4  ;;  %v59_v37 = vrot.slane %v58_v30, 2  ;;  %v699_v58 = vld [vmem:[%s1192_s0 + $0xf0] sm:$0xff]  ;;  %v704_v59 = vld [vmem:[%s1192_s0 + $0xf8] sm:$0xff] }
   0xa   :  { %364 = vperm.xlu1 %541, %v356_v3   ;;  %v79_v38 = vadd.f32 %v78_v31, %v77_v22  ;;  %v92_v39 = vrot.slane %v91_v28, 4  ;;  %v114_v41 = vsub.f32 1.0, %v113_v33  ;;  %v66_v42 = vrot.slane %v65_v34, 2 }
   0xb   :  { %336 = vperm.xlu0 %540, %v328_v4   ;;  %v99_v40 = vrot.slane %v98_v32, 4  ;;  %v73_v43 = vrot.slane %v72_v35, 2  ;;  %v86_v44 = vadd.f32 %v85_v36, %v84_v27  ;;  %v60_v45 = vadd.f32 %v59_v37, %v58_v30 }
   0xc   :  { %v80_v46 = vrot.slane %v79_v38, 2  ;;  %v93_v47 = vadd.f32 %v92_v39, %v91_v28  ;;  %v115_v49 = vmul.f32 %v544_v29, %v114_v41  ;;  %v67_v50 = vadd.f32 %v66_v42, %v65_v34 }
   0xd   :  { %v100_v48 = vadd.f32 %v99_v40, %v98_v32  ;;  %v74_v51 = vadd.f32 %v73_v43, %v72_v35  ;;  %v87_v52 = vrot.slane %v86_v44, 2  ;;  %v61_v53 = vrot.slane %v60_v45, 1 }
   0xe   :  { %v81_v54 = vadd.f32 %v80_v46, %v79_v38  ;;  %v94_v55 = vrot.slane %v93_v47, 2  ;;  %v116_v57 = vadd.f32 %v544_v29, %v115_v49  ;;  %v68_v60 = vrot.slane %v67_v50, 1 }
   0xf   :  { %v101_v56 = vrot.slane %v100_v48, 2  ;;  %v75_v61 = vrot.slane %v74_v51, 1  ;;  %v88_v62 = vadd.f32 %v87_v52, %v86_v44  ;;  %vm117_vm0 = vweird.f32 %v544_v29 }
  0x10   :  { %v62_v63 = vadd.f32 %v61_v53, %v60_v45  ;;  %v82_v1 = vrot.slane %v81_v54, 1  ;;  %v95_v2 = vadd.f32 %v94_v55, %v93_v47  ;;  %v706_v3 = vsel %vm117_vm0, %v544_v29, %v116_v57 }
  0x11   :  { %v69_v4 = vadd.f32 %v68_v60, %v67_v50  ;;  %v76_v5 = vadd.f32 %v75_v61, %v74_v51  ;;  %v89_v12 = vrot.slane %v88_v62, 1  ;;  %v102_v21 = vadd.f32 %v101_v56, %v100_v48 }
  0x12   :  { %v83_v16 = vadd.f32 %v82_v1, %v81_v54  ;;  %v96_v17 = vrot.slane %v95_v2, 1  ;;  %v105_v22 = vadd.f32 %v704_v59, %v699_v58  ;;  %v119_v26 = vmul.f32 %v706_v3, %v62_v63 }
  0x13   :  { %v90_v25 = vadd.f32 %v89_v12, %v88_v62  ;;  %v120_v27 = vmul.f32 %v706_v3, %v69_v4  ;;  %v121_v28 = vmul.f32 %v706_v3, %v76_v5  ;;  %v103_v31 = vrot.slane %v102_v21, 1 }
  0x14   :  { %v97_v30 = vadd.f32 %v96_v17, %v95_v2  ;;  %v106_v29 = vrot.slane %v105_v22, 4  ;;  %v122_v32 = vmul.f32 %v706_v3, %v83_v16  ;;  %v716_v34 = vsub.f32 %v615_v6, %v119_v26 }
  0x15   :  { %v123_v33 = vmul.f32 %v706_v3, %v90_v25  ;;  %v719_v35 = vsub.f32 %v620_v7, %v119_v26  ;;  %v722_v36 = vsub.f32 %v625_v8, %v120_v27  ;;  %v104_v37 = vadd.f32 %v103_v31, %v102_v21 }
  0x16   :  { %v107_v38 = vadd.f32 %v106_v29, %v105_v22  ;;  %v124_v39 = vmul.f32 %v706_v3, %v97_v30  ;;  %v726_v40 = vsub.f32 %v630_v9, %v120_v27  ;;  %v729_v41 = vsub.f32 %v635_v10, %v121_v28 }
  0x17   :  { %v732_v42 = vsub.f32 %v640_v11, %v121_v28  ;;  %v735_v6 = vsub.f32 %v647_v13, %v122_v32  ;;  %v738_v7 = vsub.f32 %v652_v14, %v122_v32  ;;  %v125_v43 = vmul.f32 %v706_v3, %v104_v37 }
  0x18   :  { %v108_v8 = vrot.slane %v107_v38, 2  ;;  %v742_v44 = vsub.f32 %v657_v15, %v123_v33  ;;  %v745_v9 = vsub.f32 %v666_v18, %v123_v33  ;;  %v748_v10 = vsub.f32 %v671_v19, %v124_v39 }
  0x19   :  { %v751_v11 = vsub.f32 %v676_v20, %v124_v39  ;;  %v143_v13 = vmul.f32 %v716_v34, %v716_v34  ;;  %v144_v14 = vmul.f32 %v719_v35, %v719_v35  ;;  %v758_v46 = vsub.f32 %v683_v23, %v125_v43 }
  0x1a   :  { %v109_v45 = vadd.f32 %v108_v8, %v107_v38  ;;  %v761_v15 = vsub.f32 %v688_v24, %v125_v43  ;;  %v145_v18 = vmul.f32 %v722_v36, %v722_v36  ;;  %v146_v19 = vmul.f32 %v726_v40, %v726_v40 }
  0x1b   :  { %v147_v20 = vmul.f32 %v729_v41, %v729_v41  ;;  %v148_v47 = vmul.f32 %v732_v42, %v732_v42  ;;  %v149_v48 = vmul.f32 %v735_v6, %v735_v6  ;;  %v150_v24 = vmul.f32 %v738_v7, %v738_v7 }
  0x1c   :  { %v110_v23 = vrot.slane %v109_v45, 1  ;;  %v151_v49 = vmul.f32 %v742_v44, %v742_v44  ;;  %v152_v50 = vmul.f32 %v745_v9, %v745_v9  ;;  %v153_v51 = vmul.f32 %v748_v10, %v748_v10 }
  0x1d   :  { %v154_v52 = vmul.f32 %v751_v11, %v751_v11  ;;  %v155_v53 = vmul.f32 %v758_v46, %v758_v46  ;;  %v156_v54 = vmul.f32 %v761_v15, %v761_v15  ;;  %v159_v56 = vadd.f32 %v144_v14, %v143_v13 }
  0x1e   :  { %v111_v55 = vadd.f32 %v110_v23, %v109_v45  ;;  %v166_v57 = vadd.f32 %v146_v19, %v145_v18  ;;  %v173_v60 = vadd.f32 %v148_v47, %v147_v20  ;;  %v180_v61 = vadd.f32 %v150_v24, %v149_v48 }
  0x1f   :  { %v187_v62 = vadd.f32 %v152_v50, %v151_v49  ;;  %v194_v63 = vadd.f32 %v154_v52, %v153_v51  ;;  %v201_v1 = vadd.f32 %v156_v54, %v155_v53  ;;  %v160_v4 = vrot.slane %v159_v56, 4 }
  0x20   :  { %v126_v2 = vmul.f32 %v706_v3, %v111_v55  ;;  %v167_v5 = vrot.slane %v166_v57, 4  ;;  %v174_v12 = vrot.slane %v173_v60, 4  ;;  %v181_v16 = vrot.slane %v180_v61, 4 }
  0x21   :  { %v188_v17 = vrot.slane %v187_v62, 4  ;;  %v195_v21 = vrot.slane %v194_v63, 4  ;;  %v202_v22 = vrot.slane %v201_v1, 4  ;;  %v161_v27 = vadd.f32 %v160_v4, %v159_v56 }
  0x22   :  { %v789_v25 = vsub.f32 %v699_v58, %v126_v2  ;;  %v792_v26 = vsub.f32 %v704_v59, %v126_v2  ;;  %v168_v28 = vadd.f32 %v167_v5, %v166_v57  ;;  %v175_v30 = vadd.f32 %v174_v12, %v173_v60 }
  0x23   :  { %v182_v31 = vadd.f32 %v181_v16, %v180_v61  ;;  %v189_v29 = vadd.f32 %v188_v17, %v187_v62  ;;  %v196_v32 = vadd.f32 %v195_v21, %v194_v63  ;;  %v162_v38 = vrot.slane %v161_v27, 2 }
  0x24   :  { %v157_v33 = vmul.f32 %v789_v25, %v789_v25  ;;  %v158_v37 = vmul.f32 %v792_v26, %v792_v26  ;;  %v169_v39 = vrot.slane %v168_v28, 2  ;;  %v176_v8 = vrot.slane %v175_v30, 2 }
  0x25   :  { %v183_v58 = vrot.slane %v182_v31, 2  ;;  %v190_v43 = vrot.slane %v189_v29, 2  ;;  %v197_v13 = vrot.slane %v196_v32, 2  ;;  %v163_v59 = vadd.f32 %v162_v38, %v161_v27 }
  0x26   :  { %v170_v14 = vadd.f32 %v169_v39, %v168_v28  ;;  %v203_v45 = vadd.f32 %v202_v22, %v201_v1  ;;  %v208_v18 = vadd.f32 %v158_v37, %v157_v33  ;;  %v177_v19 = vadd.f32 %v176_v8, %v175_v30 }
  0x27   :  { %v184_v20 = vadd.f32 %v183_v58, %v182_v31  ;;  %v191_v47 = vadd.f32 %v190_v43, %v189_v29  ;;  %v164_v48 = vrot.slane %v163_v59, 1  ;;  %v198_v51 = vadd.f32 %v197_v13, %v196_v32 }
  0x28   :  { %v171_v23 = vrot.slane %v170_v14, 1  ;;  %v204_v24 = vrot.slane %v203_v45, 2  ;;  %v209_v49 = vrot.slane %v208_v18, 4  ;;  %v178_v50 = vrot.slane %v177_v19, 1 }
  0x29   :  { %v185_v52 = vrot.slane %v184_v20, 1  ;;  %v165_v54 = vadd.f32 %v164_v48, %v163_v59  ;;  %v192_v57 = vrot.slane %v191_v47, 1  ;;  %v199_v62 = vrot.slane %v198_v51, 1 }
  0x2a   :  { %v210_v53 = vadd.f32 %v209_v49, %v208_v18  ;;  %v205_v55 = vadd.f32 %v204_v24, %v203_v45  ;;  %v172_v56 = vadd.f32 %v171_v23, %v170_v14  ;;  %v179_v61 = vadd.f32 %v178_v50, %v177_v19 }
  0x2b   :  { %v186_v63 = vadd.f32 %v185_v52, %v184_v20  ;;  %v215_v4 = vmul.f32 %v165_v54, %v706_v3  ;;  %v193_v5 = vadd.f32 %v192_v57, %v191_v47  ;;  %v200_v16 = vadd.f32 %v199_v62, %v198_v51 }
  0x2c   :  { %v211_v60 = vrot.slane %v210_v53, 2  ;;  %v206_v1 = vrot.slane %v205_v55, 1  ;;  %v216_v12 = vmul.f32 %v172_v56, %v706_v3  ;;  %v217_v17 = vmul.f32 %v179_v61, %v706_v3 }
  0x2d   :  { %v218_v21 = vmul.f32 %v186_v63, %v706_v3  ;;  %v802_v28 = vadd.f32 1e-05, %v215_v4  ;;  %v219_v30 = vmul.f32 %v193_v5, %v706_v3  ;;  %v220_v29 = vmul.f32 %v200_v16, %v706_v3 }
  0x2e   :  { %v212_v2 = vadd.f32 %v211_v60, %v210_v53  ;;  %v207_v22 = vadd.f32 %v206_v1, %v205_v55  ;;  %v805_v31 = vadd.f32 1e-05, %v216_v12  ;;  %v808_v32 = vadd.f32 1e-05, %v217_v17 }
  0x2f   :  { %v810_v33 = vadd.f32 1e-05, %v218_v21  ;;  %545 = vrsqrt.f32 %v802_v28  ;;  %v814_v39 = vadd.f32 1e-05, %v219_v30  ;;  %v817_v8 = vadd.f32 1e-05, %v220_v29 }
  0x30   :  { %v213_v27 = vrot.slane %v212_v2, 1  ;;  %v221_v38 = vmul.f32 %v207_v22, %v706_v3  ;;  %547 = vrsqrt.f32 %v805_v31  ;;  %vm237_vm1 = vweird.f32 %v802_v28 }
  0x31   :  { %549 = vrsqrt.f32 %v808_v32  ;;  %vm247_vm3 = vweird.f32 %v805_v31  ;;  %vm257_vm5 = vweird.f32 %v808_v32  ;;  %vm267_vm8 = vweird.f32 %v810_v33 }
  0x32   :  { %v214_v37 = vadd.f32 %v213_v27, %v212_v2  ;;  %551 = vrsqrt.f32 %v810_v33  ;;  %v822_v43 = vadd.f32 1e-05, %v221_v38  ;;  %vm277_vm12 = vweird.f32 %v814_v39 }
  0x33   :  { %553 = vrsqrt.f32 %v814_v39  ;;  %vm287_vm15 = vweird.f32 %v817_v8 }
  0x34   :  { %v222_v58 = vmul.f32 %v214_v37, %v706_v3  ;;  %555 = vrsqrt.f32 %v817_v8 }
  0x35   :  { %v825_v13 = vpop.eup %545  ;;  %557 = vrsqrt.f32 %v822_v43 }
  0x36   :  { %v828_v59 = vpop.eup %547  ;;  %v832_v45 = vadd.f32 1e-05, %v222_v58  ;;  %v232_v3 = vmul.f32 %v825_v13, %v802_v28  ;;  %vm238_vm2 = vweird.f32 %v825_v13 }
  0x37   :  { %v830_v14 = vpop.eup %549  ;;  %v242_v20 = vmul.f32 %v828_v59, %v805_v31  ;;  %vm248_vm4 = vweird.f32 %v828_v59  ;;  %vm877_vm7 = vmor %vm237_vm1, %vm238_vm2  ;;  %vm297_vm2 = vweird.f32 %v822_v43 }
  0x38   :  { %v835_v18 = vpop.eup %551  ;;  %v252_v48 = vmul.f32 %v830_v14, %v808_v32  ;;  %559 = vrsqrt.f32 %v832_v45  ;;  %v233_v49 = vmul.f32 %v825_v13, %v232_v3  ;;  %vm258_vm6 = vweird.f32 %v830_v14  ;;  %vm249_vm10 = vmor %vm247_vm3, %vm248_vm4 }
  0x39   :  { %v839_v19 = vpop.eup %553  ;;  %v262_v23 = vmul.f32 %v835_v18, %v810_v33  ;;  %v243_v51 = vmul.f32 %v828_v59, %v242_v20  ;;  %vm268_vm9 = vweird.f32 %v835_v18  ;;  %vm887_vm11 = vmor %vm257_vm5, %vm258_vm6  ;;  %vm307_vm5 = vweird.f32 %v832_v45 }
  0x3a   :  { %v843_v47 = vpop.eup %555  ;;  %v272_v50 = vmul.f32 %v839_v19, %v814_v39  ;;  %v253_v53 = vmul.f32 %v830_v14, %v252_v48  ;;  %v234_v57 = vmul.f32 0.5, %v233_v49  ;;  %vm278_vm13 = vweird.f32 %v839_v19  ;;  %vm269_vm14 = vmor %vm267_vm8, %vm268_vm9  ;;  %v383_v49 = vld [vmem:[%s1193_s1] sm:$0x1] }
  0x3b   :  { %v850_v24 = vpop.eup %557  ;;  %v282_v52 = vmul.f32 %v843_v47, %v817_v8  ;;  %v263_v54 = vmul.f32 %v835_v18, %v262_v23  ;;  %v244_v61 = vmul.f32 0.5, %v243_v51  ;;  %vm288_vm0 = vweird.f32 %v843_v47  ;;  %vm279_vm1 = vmor %vm277_vm12, %vm278_vm13 }
  0x3c   :  { %v292_v55 = vmul.f32 %v850_v24, %v822_v43  ;;  %v273_v60 = vmul.f32 %v839_v19, %v272_v50  ;;  %v254_v63 = vmul.f32 0.5, %v253_v53  ;;  %v235_v5 = vsub.f32 1.5, %v234_v57  ;;  %vm289_vm4 = vmor %vm287_vm15, %vm288_vm0 }
  0x3d   :  { %v283_v62 = vmul.f32 %v843_v47, %v282_v52  ;;  %v264_v1 = vmul.f32 0.5, %v263_v54  ;;  %v245_v16 = vsub.f32 1.5, %v244_v61  ;;  %vm298_vm3 = vweird.f32 %v850_v24 }
  0x3e   :  { %v862_v56 = vpop.eup %559  ;;  %v293_v2 = vmul.f32 %v850_v24, %v292_v55  ;;  %v274_v12 = vmul.f32 0.5, %v273_v60  ;;  %v255_v21 = vsub.f32 1.5, %v254_v63  ;;  %v236_v29 = vmul.f32 %v825_v13, %v235_v5  ;;  %vm299_vm9 = vmor %vm297_vm2, %vm298_vm3 }
  0x3f   :  { %v302_v4 = vmul.f32 %v862_v56, %v832_v45  ;;  %v284_v17 = vmul.f32 0.5, %v283_v62  ;;  %v265_v22 = vsub.f32 1.5, %v264_v1  ;;  %v246_v38 = vmul.f32 %v828_v59, %v245_v16 }
  0x40   :  { %v294_v27 = vmul.f32 0.5, %v293_v2  ;;  %v275_v37 = vsub.f32 1.5, %v274_v12  ;;  %v256_v58 = vmul.f32 %v830_v14, %v255_v21  ;;  %v240_v48 = vsel %vm877_vm7, %v825_v13, %v236_v29 }
  0x41   :  { %v303_v30 = vmul.f32 %v862_v56, %v302_v4  ;;  %v285_v32 = vsub.f32 1.5, %v284_v17  ;;  %v266_v20 = vmul.f32 %v835_v18, %v265_v22  ;;  %v250_v39 = vsel %vm249_vm10, %v828_v59, %v246_v38 }
  0x42   :  { %v295_v31 = vsub.f32 1.5, %v294_v27  ;;  %v276_v23 = vmul.f32 %v839_v19, %v275_v37  ;;  %v260_v8 = vsel %vm887_vm11, %v830_v14, %v256_v58  ;;  %vm308_vm6 = vweird.f32 %v862_v56 }
  0x43   :  { %v304_v33 = vmul.f32 0.5, %v303_v30  ;;  %v286_v50 = vmul.f32 %v843_v47, %v285_v32  ;;  %v270_v13 = vsel %vm269_vm14, %v835_v18, %v266_v20  ;;  %vm384_vm7 = vcmp.gt.s32.totalorder %v383_v49, 0  ;;  %vm309_vm10 = vmor %vm307_vm5, %vm308_vm6 }
  0x44   :  { %v296_v59 = vmul.f32 %v850_v24, %v295_v31  ;;  %vm385_vm8 = vcmp.gt.s32.totalorder %v383_v49, 1  ;;  %v280_v43 = vsel %vm279_vm1, %v839_v19, %v276_v23  ;;  %v311_v52 = vmul.f32 %v240_v48, %v716_v34 }
  0x45   :  { %v305_v51 = vsub.f32 1.5, %v304_v33  ;;  %v312_v53 = vmul.f32 %v240_v48, %v719_v35  ;;  %v313_v14 = vmul.f32 %v250_v39, %v722_v36  ;;  %v290_v18 = vsel %vm289_vm4, %v843_v47, %v286_v50 }
  0x46   :  { %v314_v54 = vmul.f32 %v250_v39, %v726_v40  ;;  %v315_v55 = vmul.f32 %v260_v8, %v729_v41  ;;  %v316_v57 = vmul.f32 %v260_v8, %v732_v42  ;;  %v317_v60 = vmul.f32 %v270_v13, %v735_v6 }
  0x47   :  { %v318_v61 = vmul.f32 %v270_v13, %v738_v7  ;;  %v392_v19 = vsel %vm384_vm7, 1, %v561_v0  ;;  %v393_v34 = vsel %vm385_vm8, 1, %v561_v0  ;;  %v300_v35 = vsel %vm299_vm9, %v850_v24, %v296_v59 }
  0x48   :  { %v306_v36 = vmul.f32 %v862_v56, %v305_v51  ;;  %v319_v47 = vmul.f32 %v280_v43, %v742_v44  ;;  %v320_v40 = vmul.f32 %v280_v43, %v745_v9  ;;  %vm386_vm11 = vcmp.gt.s32.totalorder %v383_v49, 2 }
  0x49   :  { %vm387_vm12 = vcmp.gt.s32.totalorder %v383_v49, 3  ;;  %vm388_vm13 = vcmp.gt.s32.totalorder %v383_v49, 4  ;;  %vm389_vm14 = vcmp.gt.s32.totalorder %v383_v49, 5  ;;  %v400_v7 = vperm.slane %v392_v19, 0 }
  0x4a   :  { %v401_v44 = vperm.slane %v393_v34, 0  ;;  %v321_v9 = vmul.f32 %v290_v18, %v748_v10  ;;  %v322_v24 = vmul.f32 %v290_v18, %v751_v11  ;;  %v323_v63 = vmul.f32 %v300_v35, %v758_v46 }
  0x4b   :  { %vm390_vm15 = vcmp.gt.s32.totalorder %v383_v49, 6  ;;  %v310_v45 = vsel %vm309_vm10, %v862_v56, %v306_v36  ;;  %vm391_vm0 = vcmp.gt.s32.totalorder %v383_v49, 7  ;;  %v394_v1 = vsel %vm386_vm11, 1, %v561_v0 }
  0x4c   :  { %v395_v2 = vsel %vm387_vm12, 1, %v561_v0  ;;  %v396_v10 = vsel %vm388_vm13, 1, %v561_v0  ;;  %v397_v11 = vsel %vm389_vm14, 1, %v561_v0  ;;  %v324_v46 = vmul.f32 %v300_v35, %v761_v15 }
  0x4d   :  { %v398_v56 = vsel %vm390_vm15, 1, %v561_v0  ;;  %vm958_vm1 = vcmp.eq.s32.totalorder %v400_v7, 1  ;;  %vm962_vm2 = vcmp.eq.s32.totalorder %v401_v44, 1  ;;  %v325_v17 = vmul.f32 %v310_v45, %v789_v25 }
  0x4e   :  { %v399_v22 = vsel %vm391_vm0, 1, %v561_v0  ;;  %v402_v27 = vperm.slane %v394_v1, 0  ;;  %v326_v30 = vmul.f32 %v310_v45, %v792_v26  ;;  %v403_v15 = vperm.slane %v395_v2, 0 }
  0x4f   :  { %v404_v29 = vperm.slane %v396_v10, 0  ;;  %v405_v28 = vperm.slane %v397_v11, 0  ;;  %v406_v32 = vperm.slane %v398_v56, 0  ;;  %v407_v31 = vperm.slane %v399_v22, 0  ;;  %v36_v10 = vld [vmem:[%s1192_s0 + $0x60] sm:$0xff] }
  0x50   :  { %vm979_vm3 = vcmp.eq.s32.totalorder %v402_v27, 1  ;;  %vm985_vm4 = vcmp.eq.s32.totalorder %v403_v15, 1  ;;  %v1019_v2 = vstv %s1194_s5 }
  0x51   :  { %vm990_vm5 = vcmp.eq.s32.totalorder %v404_v29, 1  ;;  %vm1008_vm6 = vcmp.eq.s32.totalorder %v405_v28, 1  ;;  %vm1021_vm7 = vcmp.eq.s32.totalorder %v406_v32, 1  ;;  %vm1032_vm8 = vcmp.eq.s32.totalorder %v407_v31, 1 }
  0x74   :  { %v930_v62 = vpop.permute.xlu1 %359 }
  0x75   :  { %v932_v41 = vpop.permute.xlu0 %331 }
  0x76   :  { %v339_v42 = vmul.f32 %v932_v41, %v311_v52  ;;  %v341_v6 = vmul.f32 %v932_v41, %v313_v14  ;;  %v343_v21 = vmul.f32 %v932_v41, %v315_v55  ;;  %v345_v38 = vmul.f32 %v932_v41, %v317_v60 }
  0x77   :  { %v347_v48 = vmul.f32 %v932_v41, %v319_v47  ;;  %v349_v39 = vmul.f32 %v932_v41, %v321_v9  ;;  %v353_v19 = vmul.f32 %v932_v41, %v325_v17 }
  0x78   :  { %v947_v4 = vadd.f32 %v930_v62, %v339_v42  ;;  %v950_v5 = vadd.f32 %v930_v62, %v341_v6  ;;  %v371_v23 = vadd.f32 %v930_v62, %v343_v21  ;;  %v373_v43 = vadd.f32 %v930_v62, %v345_v38 }
  0x79   :  { %v375_v60 = vadd.f32 %v930_v62, %v347_v48  ;;  %v377_v34 = vadd.f32 %v930_v62, %v349_v39  ;;  %v1026_v12 = vadd.f32 %v930_v62, %v353_v19  ;;  %v29_v19 = vld [vmem:[%s1192_s0 + $0x28] sm:$0xff] }
  0x7a   :  { %v416_v58 = vsel %vm958_vm1, %v947_v4, 0.0  ;;  %v418_v25 = vsel %vm962_vm2, %v950_v5, 0.0  ;;  %v422_v6 = vsel %vm985_vm4, %v373_v43, 0.0  ;;  %v454_v38 = vmul.f32 %v1019_v2, %v947_v4 }
  0x7b   :  { %v432_v13 = vadd.f32 %v418_v25, %v416_v58  ;;  %v424_v1 = vsel %vm990_vm5, %v375_v60, 0.0  ;;  %v426_v17 = vsel %vm1008_vm6, %v377_v34, 0.0  ;;  %v456_v32 = vmul.f32 %v1019_v2, %v950_v5 }
  0x7c   :  { %v365_v26 = vpop.permute.xlu1 %364  ;;  %v430_v25 = vsel %vm1032_vm8, %v1026_v12, 0.0  ;;  %v470_v39 = vadd.f32 1.0, %v454_v38  ;;  %v468_v21 = vmul.f32 %v1019_v2, %v1026_v12  ;;  %v41_v12 = vld [vmem:[%s1192_s0 + $0x88] sm:$0xff] }
  0x7d   :  { %v337_v37 = vpop.permute.xlu0 %336 }
  0x7e   :  { %v340_v3 = vmul.f32 %v337_v37, %v312_v53  ;;  %v342_v0 = vmul.f32 %v337_v37, %v314_v54  ;;  %v344_v20 = vmul.f32 %v337_v37, %v316_v57  ;;  %v346_v33 = vmul.f32 %v337_v37, %v318_v61 }
  0x7f   :  { %v348_v59 = vmul.f32 %v337_v37, %v320_v40  ;;  %v351_v53 = vmul.f32 %v932_v41, %v323_v63  ;;  %v350_v55 = vmul.f32 %v337_v37, %v322_v24  ;;  %v420_v61 = vsel %vm979_vm3, %v371_v23, 0.0 }
  0x80   :  { %v368_v50 = vadd.f32 %v365_v26, %v340_v3  ;;  %v370_v8 = vadd.f32 %v365_v26, %v342_v0  ;;  %v372_v51 = vadd.f32 %v365_v26, %v344_v20  ;;  %v374_v57 = vadd.f32 %v365_v26, %v346_v33 }
  0x81   :  { %v433_v35 = vadd.f32 %v432_v13, %v420_v61  ;;  %v352_v47 = vmul.f32 %v337_v37, %v324_v46  ;;  %v376_v40 = vadd.f32 %v365_v26, %v348_v59  ;;  %v379_v7 = vadd.f32 %v930_v62, %v351_v53 }
  0x82   :  { %v417_v18 = vsel %vm958_vm1, %v368_v50, 0.0  ;;  %v419_v54 = vsel %vm962_vm2, %v370_v8, 0.0  ;;  %v421_v42 = vsel %vm979_vm3, %v372_v51, 0.0  ;;  %v354_v24 = vmul.f32 %v337_v37, %v326_v30  ;;  %v542_v37 = vld [vmem:[%s1191_s2] ss:$0 sm:$0xff] }
  0x83   :  { %v439_v36 = vadd.f32 %v419_v54, %v417_v18  ;;  %v434_v9 = vadd.f32 %v433_v35, %v422_v6  ;;  %v378_v63 = vadd.f32 %v365_v26, %v350_v55  ;;  %v423_v45 = vsel %vm985_vm4, %v374_v57, 0.0  ;;  %v25_v18 = vld [vmem:[%s1192_s0 + $0x8] sm:$0xff]  ;;  %v28_v54 = vld [vmem:[%s1192_s0 + $0x20] sm:$0xff] }
  0x84   :  { %v380_v56 = vadd.f32 %v365_v26, %v352_v47  ;;  %v425_v16 = vsel %vm990_vm5, %v376_v40, 0.0  ;;  %v1036_v30 = vadd.f32 %v365_v26, %v354_v24  ;;  %v428_v62 = vsel %vm1021_vm7, %v379_v7, 0.0 }
  0x85   :  { %v440_v41 = vadd.f32 %v439_v36, %v421_v42  ;;  %v435_v11 = vadd.f32 %v434_v9, %v424_v1  ;;  %v427_v15 = vsel %vm1008_vm6, %v378_v63, 0.0  ;;  %v455_v3 = vmul.f32 %v1019_v2, %v368_v50  ;;  %v33_v9 = vld [vmem:[%s1192_s0 + $0x48] sm:$0xff] }
  0x86   :  { %v429_v58 = vsel %vm1021_vm7, %v380_v56, 0.0  ;;  %v457_v0 = vmul.f32 %v1019_v2, %v370_v8  ;;  %v458_v26 = vmul.f32 %v1019_v2, %v371_v23  ;;  %v431_v4 = vsel %vm1032_vm8, %v1036_v30, 0.0 }
  0x87   :  { %v441_v46 = vadd.f32 %v440_v41, %v423_v45  ;;  %v436_v22 = vadd.f32 %v435_v11, %v426_v17  ;;  %v459_v5 = vmul.f32 %v1019_v2, %v372_v51  ;;  %v460_v33 = vmul.f32 %v1019_v2, %v373_v43  ;;  %v24_v43 = vld [vmem:[%s1192_s0] sm:$0xff]  ;;  %v37_v17 = vld [vmem:[%s1192_s0 + $0x68] sm:$0xff] }
  0x88   :  { %v472_v13 = vadd.f32 1.0, %v456_v32  ;;  %v461_v50 = vmul.f32 %v1019_v2, %v374_v57  ;;  %v462_v8 = vmul.f32 %v1019_v2, %v375_v60  ;;  %v471_v59 = vadd.f32 1.0, %v455_v3 }
  0x89   :  { %v442_v27 = vadd.f32 %v441_v46, %v425_v16  ;;  %v437_v29 = vadd.f32 %v436_v22, %v428_v62  ;;  %v473_v52 = vadd.f32 1.0, %v457_v0  ;;  %v474_v53 = vadd.f32 1.0, %v458_v26  ;;  %v45_v0 = vld [vmem:[%s1192_s0 + $0xa8] sm:$0xff] }
  0x8a   :  { %v463_v55 = vmul.f32 %v1019_v2, %v376_v40  ;;  %v464_v57 = vmul.f32 %v1019_v2, %v377_v34  ;;  %v466_v60 = vmul.f32 %v1019_v2, %v379_v7  ;;  %v475_v61 = vadd.f32 1.0, %v459_v5  ;;  %v32_v40 = vld [vmem:[%s1192_s0 + $0x40] sm:$0xff] }
  0x8b   :  { %v443_v28 = vadd.f32 %v442_v27, %v427_v15  ;;  %v438_v20 = vadd.f32 %v437_v29, %v430_v25  ;;  %v476_v35 = vadd.f32 1.0, %v460_v33  ;;  %v465_v34 = vmul.f32 %v1019_v2, %v378_v63 }
  0x8c   :  { %v477_v6 = vadd.f32 1.0, %v461_v50  ;;  %v478_v7 = vadd.f32 1.0, %v462_v8  ;;  %v467_v11 = vmul.f32 %v1019_v2, %v380_v56  ;;  %v479_v63 = vadd.f32 1.0, %v463_v55  ;;  %v40_v56 = vld [vmem:[%s1192_s0 + $0x80] sm:$0xff] }
  0x8d   :  { %v444_v31 = vadd.f32 %v443_v28, %v429_v58  ;;  %v1062_v49 = vmul.f32 %v542_v37, %v438_v20  ;;  %v480_v22 = vadd.f32 1.0, %v464_v57  ;;  %v469_v62 = vmul.f32 %v1019_v2, %v1036_v30  ;;  %v44_v2 = vld [vmem:[%s1192_s0 + $0xa0] sm:$0xff] }
  0x8e   :  { %v481_v29 = vadd.f32 1.0, %v465_v34  ;;  %v482_v38 = vadd.f32 1.0, %v466_v60  ;;  %v483_v30 = vadd.f32 1.0, %v467_v11  ;;  %v484_v20 = vadd.f32 1.0, %v468_v21  ;;  %v52_v8 = vld [vmem:[%s1192_s0 + $0xe0] sm:$0xff] }
  0x8f   :  { %v445_v48 = vadd.f32 %v444_v31, %v431_v4  ;;  %v486_v14 = vadd.f32 %v470_v39, %v1062_v49  ;;  %v488_v51 = vadd.f32 %v472_v13, %v1062_v49  ;;  %v490_v42 = vadd.f32 %v474_v53, %v1062_v49  ;;  %v48_v4 = vld [vmem:[%s1192_s0 + $0xc0] sm:$0xff]  ;;  %v49_v39 = vld [vmem:[%s1192_s0 + $0xc8] sm:$0xff] }
  0x90   :  { %v492_v41 = vadd.f32 %v476_v35, %v1062_v49  ;;  %v494_v27 = vadd.f32 %v478_v7, %v1062_v49  ;;  %v496_v32 = vadd.f32 %v480_v22, %v1062_v49  ;;  %v498_v31 = vadd.f32 %v482_v38, %v1062_v49 }
  0x91   :  { %v1066_v23 = vmul.f32 %v542_v37, %v445_v48  ;;  %v502_v24 = vmul.f32 %v486_v14, %v24_v43  ;;  %v504_v1 = vmul.f32 %v488_v51, %v28_v54  ;;  %v506_v15 = vmul.f32 %v490_v42, %v32_v40 }
  0x92   :  { %v508_v58 = vmul.f32 %v492_v41, %v36_v10  ;;  %v510_v26 = vmul.f32 %v494_v27, %v40_v56  ;;  %v485_v5 = vadd.f32 1.0, %v469_v62  ;;  %v500_v13 = vadd.f32 %v484_v20, %v1062_v49  ;;  %v53_v49 = vld [vmem:[%s1192_s0 + $0xe8] sm:$0xff] }
  0x93   :  { %v487_v36 = vadd.f32 %v471_v59, %v1066_v23  ;;  %v489_v47 = vadd.f32 %v473_v52, %v1066_v23  ;;  %v491_v44 = vadd.f32 %v475_v61, %v1066_v23  ;;  %v493_v46 = vadd.f32 %v477_v6, %v1066_v23  ;;  %518 = vst [vmem:[%s1195_s6] sm:$0xff] %v502_v24 }
  0x94   :  { %v495_v28 = vadd.f32 %v479_v63, %v1066_v23  ;;  %520 = vst [vmem:[%s1195_s6 + $0x10] sm:$0xff] %v504_v1  ;;  %v497_v25 = vadd.f32 %v481_v29, %v1066_v23  ;;  %v499_v33 = vadd.f32 %v483_v30, %v1066_v23  ;;  %v512_v50 = vmul.f32 %v496_v32, %v44_v2 }
  0x95   :  { %v503_v45 = vmul.f32 %v487_v36, %v25_v18  ;;  %v505_v16 = vmul.f32 %v489_v47, %v29_v19  ;;  %v507_v37 = vmul.f32 %v491_v44, %v33_v9  ;;  %v509_v3 = vmul.f32 %v493_v46, %v37_v17  ;;  %522 = vst [vmem:[%s1195_s6 + $0x20] sm:$0xff] %v506_v15 }
  0x96   :  { %v511_v48 = vmul.f32 %v495_v28, %v41_v12  ;;  %524 = vst [vmem:[%s1195_s6 + $0x30] sm:$0xff] %v508_v58  ;;  %v501_v59 = vadd.f32 %v485_v5, %v1066_v23  ;;  %v513_v52 = vmul.f32 %v497_v25, %v45_v0  ;;  %v514_v53 = vmul.f32 %v498_v31, %v48_v4 }
  0x97   :  { %519 = vst [vmem:[%s1195_s6 + $0x8] sm:$0xff] %v503_v45  ;;  %v515_v14 = vmul.f32 %v499_v33, %v49_v39  ;;  %v516_v23 = vmul.f32 %v500_v13, %v52_v8 }
  0x98   :  { %521 = vst [vmem:[%s1195_s6 + $0x18] sm:$0xff] %v505_v16  ;;  %v517_v51 = vmul.f32 %v501_v59, %v53_v49 }
  0x99   :  { %523 = vst [vmem:[%s1195_s6 + $0x28] sm:$0xff] %v507_v37 }
  0x9a   :  { %525 = vst [vmem:[%s1195_s6 + $0x38] sm:$0xff] %v509_v3 }
  0x9b   :  { %526 = vst [vmem:[%s1195_s6 + $0x40] sm:$0xff] %v510_v26 }
  0x9c   :  { %527 = vst [vmem:[%s1195_s6 + $0x48] sm:$0xff] %v511_v48 }
  0x9d   :  { %528 = vst [vmem:[%s1195_s6 + $0x50] sm:$0xff] %v512_v50 }
  0x9e   :  { %529 = vst [vmem:[%s1195_s6 + $0x58] sm:$0xff] %v513_v52 }
  0x9f   :  { %530 = vst [vmem:[%s1195_s6 + $0x60] sm:$0xff] %v514_v53 }
  0xa0   :  { %531 = vst [vmem:[%s1195_s6 + $0x68] sm:$0xff] %v515_v14 }
  0xa1   :  { %532 = vst [vmem:[%s1195_s6 + $0x70] sm:$0xff] %v516_v23 }
  0xa2   :  { %533 = vst [vmem:[%s1195_s6 + $0x78] sm:$0xff] %v517_v51 }

</bundles_post_ra>
